<compile_context>
chip_gen: v7x
topology: tpu7x:2x2x1
jax: 0.10.0
libtpu: 0.0.40
codegen_flags: <defaults>
</compile_context>

<pallas_src>
import jax
import jax.numpy as jnp
from jax.experimental import pallas as pl
from jax.experimental.pallas import tpu as pltpu


def _outconv_vpu_kernel(x_ref, w_ref, b_ref, o_ref):
    """Small-channel / small-tile fast path: a few VPU broadcast-FMAs, no MXU.

    x_ref: (1, Cin, T)  w_ref: (Cout, Cin)  b_ref: (Cout, 1)  o_ref: (1, Cout, T)
    """
    x = x_ref[0].astype(jnp.float32)        # (Cin, T)
    w = w_ref[...].astype(jnp.float32)      # (Cout, Cin)
    b = b_ref[...].astype(jnp.float32)      # (Cout, 1)
    cin, t = x.shape
    cout = w.shape[0]
    acc = jnp.broadcast_to(b, (cout, t))    # hoisted once (not re-broadcast per k)
    for k in range(cin):                    # tiny static unroll over input channels
        acc = acc + w[:, k:k + 1] * x[k:k + 1, :]
    o_ref[0] = acc.astype(o_ref.dtype)


def _outconv_mxu_kernel(x_ref, w_ref, b_ref, o_ref):
    """General path: channel mix on the MXU with f32 accumulation."""
    acc = jnp.dot(w_ref[...], x_ref[0], preferred_element_type=jnp.float32)
    o_ref[0] = (acc + b_ref[...].astype(jnp.float32)).astype(o_ref.dtype)


def _round_up(x, m):
    return ((x + m - 1) // m) * m


def _vmem_capacity_bytes():
    # Per-TensorCore physical VMEM; conservative fallback = v7x's 64 MiB.
    try:
        return int(pltpu.get_tpu_info().vmem_capacity_bytes)
    except Exception:
        return 64 * 1024 * 1024


def outconv_pallas(x_nchw, weight, bias, *, target_step_bytes=4 * 1024 * 1024):
    """1x1 Conv2d (PyTorch nn.Conv2d(in, out, kernel_size=1) forward).

    x_nchw: (N, Cin, H, W); weight: (Cout, Cin, 1, 1); bias: (Cout,).
    Returns (N, Cout, H, W) in x's dtype.
    """
    N, Cin, H, W = x_nchw.shape
    Cout = weight.shape[0]
    HW = H * W
    dtype = x_nchw.dtype
    itemsize = jnp.dtype(dtype).itemsize

    # Free reshapes only -- no transpose, no pad, no extra HBM passes.
    x3 = x_nchw.reshape(N, Cin, HW)          # (N, Cin, HW)
    w2d = weight.reshape(Cout, Cin)          # (Cout, Cin)
    b2d = bias.reshape(Cout, 1)              # (Cout, 1)

    # ---- VMEM budgeting (per generation) -----------------------------------
    # Sublane padding unit for the I/O dtype (8 for f32, 16 for bf16, 32 i8).
    sub = max(8, 32 // max(itemsize, 1))
    cin_p = _round_up(Cin, sub)
    cout_p = _round_up(Cout, sub)

    def vmem_bytes(t):
        # 2 buffers each for the x and out blocks (sublane-padded), the f32
        # accumulator intermediate inside the body, and the resident (tiny,
        # lane/sublane-padded) weight & bias blocks.
        io = 2 * (cin_p + cout_p) * t * itemsize
        acc = _round_up(Cout, 8) * t * 4
        wb = (cout_p * _round_up(Cin, 128) + cout_p * 128) * itemsize
        return io + acc + wb

    vmem_phys = _vmem_capacity_bytes()
    # Target our block footprint at ~half of physical VMEM; set the scoped
    # limit higher than our own estimate to leave slack for compiler scratch.
    # v5e/v6e (128 MiB phys): budget 64 MiB, limit 96 MiB.
    # v7x    ( 64 MiB phys): budget 32 MiB, limit 48 MiB.
    budget = min(vmem_phys // 2, 64 * 1024 * 1024)
    vmem_limit = min((vmem_phys * 3) // 4, 96 * 1024 * 1024)

    # ---- Tile selection: bytes-per-step, prefer one contiguous DMA ---------
    if HW <= 128:
        tile = HW                                            # full extent, always legal
    else:
        # Lane count that moves ~target_step_bytes of x+out per grid step.
        tile = max(128, (target_step_bytes // ((Cin + Cout) * itemsize)) // 128 * 128)
        if HW <= tile or vmem_bytes(HW) <= budget:
            # Whole image per step: one contiguous Cin*HW*itemsize DMA instead
            # of Cin short strided rows -> best achieved HBM bandwidth.
            tile = HW
        else:
            tile = min(tile, max(128, (HW // 128) * 128))
        # Hard VMEM guard: always terminates, always lands on a multiple of
        # 128 (ragged last block along HW is handled by Pallas via masking).
        while tile > 128 and vmem_bytes(tile) > budget:
            tile = max(128, ((tile // 2) + 127) // 128 * 128)
        # Keep both v7x TensorCores busy: avoid a (1, 1) grid when N == 1.
        # Costs one extra ~0.35 us step on single-core parts -> negligible.
        if N == 1 and tile >= HW and HW >= 256:
            tile = max(128, (((HW + 1) // 2) + 127) // 128 * 128)

    grid = (N, pl.cdiv(HW, tile))

    # ---- Compute-path choice (secondary; the kernel is HBM-bound) ----------
    # VPU path only for tiny channel counts, f32, and small tiles: the
    # (Cout, tile) f32 accumulator is live across the unrolled Cin loop, so
    # large tiles would spill vregs; bf16 would be promoted on v5e's VPU.
    use_vpu = (Cin <= 8 and Cout <= 8 and dtype == jnp.float32 and tile <= 1024)
    kernel = _outconv_vpu_kernel if use_vpu else _outconv_mxu_kernel

    cost = pl.CostEstimate(
        flops=2 * N * Cin * Cout * HW,
        transcendentals=0,
        bytes_accessed=(N * (Cin + Cout) * HW + Cout * Cin + Cout) * itemsize,
    )

    out3 = pl.pallas_call(
        kernel,
        out_shape=jax.ShapeDtypeStruct((N, Cout, HW), dtype),
        grid_spec=pltpu.PrefetchScalarGridSpec(
            num_scalar_prefetch=0,
            grid=grid,
            in_specs=[
                pl.BlockSpec((1, Cin, tile), lambda n, j: (n, 0, j)),   # x tile
                pl.BlockSpec((Cout, Cin), lambda n, j: (0, 0)),         # full weight
                pl.BlockSpec((Cout, 1), lambda n, j: (0, 0)),           # full bias
            ],
            out_specs=pl.BlockSpec((1, Cout, tile), lambda n, j: (n, 0, j)),
        ),
        compiler_params=pltpu.CompilerParams(
            # Both axes independent -> shardable across TensorCores (v7x).
            dimension_semantics=("parallel", "parallel"),
            vmem_limit_bytes=int(vmem_limit),
        ),
        cost_estimate=cost,
    )(x3, w2d, b2d)

    return out3.reshape(N, Cout, H, W)       # free reshape back to NCHW


if __name__ == "__main__":
    # Deterministic synthetic params / input (small shapes).
    N, Cin, Cout, Hs, Ws = 2, 4, 3, 16, 16
    key = jax.random.PRNGKey(0)
    kx, kw, kb = jax.random.split(key, 3)

    x = jax.random.normal(kx, (N, Cin, Hs, Ws), dtype=jnp.float32)
    # nn.Conv2d(in, out, kernel_size=1): weight (Cout, Cin, 1, 1), bias (Cout,)
    weight = jax.random.normal(kw, (Cout, Cin, 1, 1), dtype=jnp.float32) * 0.1
    bias = jax.random.normal(kb, (Cout,), dtype=jnp.float32) * 0.1

    out = outconv_pallas(x, weight, bias)
    out = jax.block_until_ready(out)

    # Sanity check against a plain-JAX reference of the 1x1 conv.
    ref = jnp.einsum("nchw,oc->nohw", x, weight.reshape(Cout, Cin)) \
        + bias[None, :, None, None]
    assert out.shape == (N, Cout, Hs, Ws)
    assert jnp.allclose(out, ref, atol=1e-5, rtol=1e-5)

    print("KERNEL_OK")
</pallas_src>

<mosaic_0001>
module attributes {stable_mosaic.version = 11 : i64} {
  func.func @_outconv_vpu_kernel(%arg0: i32, %arg1: i32, %arg2: memref<1x4x256xf32, #tpu.memory_space<vmem>>, %arg3: memref<3x4xf32, #tpu.memory_space<vmem>>, %arg4: memref<3x1xf32, #tpu.memory_space<vmem>>, %arg5: memref<1x3x256xf32, #tpu.memory_space<vmem>>) attributes {dimension_semantics = [#tpu.dimension_semantics<parallel>, #tpu.dimension_semantics<parallel>], iteration_bounds = array<i64: 2, 1>, scalar_prefetch = 0 : i64, scratch_operands = 0 : i64, tpu.core_type = #tpu.core_type<tc>, window_params = [{transform_indices = @transform_0, window_bounds = array<i64: 1, 4, 256>}, {pipeline_mode = #tpu.pipeline_mode<synchronous>, transform_indices = @transform_1, window_bounds = array<i64: 3, 4>}, {pipeline_mode = #tpu.pipeline_mode<synchronous>, transform_indices = @transform_2, window_bounds = array<i64: 3, 1>}, {transform_indices = @transform_3, window_bounds = array<i64: 1, 3, 256>}]} {
    %c0 = arith.constant 0 : index
    %c0_0 = arith.constant 0 : index
    %c0_1 = arith.constant 0 : index
    %0 = vector.load %arg2[%c0, %c0_0, %c0_1] : memref<1x4x256xf32, #tpu.memory_space<vmem>>, vector<1x4x256xf32>
    %1 = vector.shape_cast %0 : vector<1x4x256xf32> to vector<4x256xf32>
    %c0_2 = arith.constant 0 : index
    %c0_3 = arith.constant 0 : index
    %2 = vector.load %arg3[%c0_2, %c0_3] : memref<3x4xf32, #tpu.memory_space<vmem>>, vector<3x4xf32>
    %c0_4 = arith.constant 0 : index
    %c0_5 = arith.constant 0 : index
    %3 = vector.load %arg4[%c0_4, %c0_5] : memref<3x1xf32, #tpu.memory_space<vmem>>, vector<3x1xf32>
    %4 = vector.shape_cast %3 : vector<3x1xf32> to vector<3x1xf32>
    %5 = vector.broadcast %4 : vector<3x1xf32> to vector<3x256xf32>
    %6 = vector.extract_strided_slice %2 {offsets = [0, 0], sizes = [3, 1], strides = [1, 1]} : vector<3x4xf32> to vector<3x1xf32>
    %7 = vector.extract_strided_slice %1 {offsets = [0, 0], sizes = [1, 256], strides = [1, 1]} : vector<4x256xf32> to vector<1x256xf32>
    %8 = vector.broadcast %6 : vector<3x1xf32> to vector<3x256xf32>
    %9 = vector.broadcast %7 : vector<1x256xf32> to vector<3x256xf32>
    %10 = arith.mulf %8, %9 : vector<3x256xf32>
    %11 = arith.addf %5, %10 : vector<3x256xf32>
    %12 = vector.extract_strided_slice %2 {offsets = [0, 1], sizes = [3, 1], strides = [1, 1]} : vector<3x4xf32> to vector<3x1xf32>
    %13 = vector.extract_strided_slice %1 {offsets = [1, 0], sizes = [1, 256], strides = [1, 1]} : vector<4x256xf32> to vector<1x256xf32>
    %14 = vector.broadcast %12 : vector<3x1xf32> to vector<3x256xf32>
    %15 = vector.broadcast %13 : vector<1x256xf32> to vector<3x256xf32>
    %16 = arith.mulf %14, %15 : vector<3x256xf32>
    %17 = arith.addf %11, %16 : vector<3x256xf32>
    %18 = vector.extract_strided_slice %2 {offsets = [0, 2], sizes = [3, 1], strides = [1, 1]} : vector<3x4xf32> to vector<3x1xf32>
    %19 = vector.extract_strided_slice %1 {offsets = [2, 0], sizes = [1, 256], strides = [1, 1]} : vector<4x256xf32> to vector<1x256xf32>
    %20 = vector.broadcast %18 : vector<3x1xf32> to vector<3x256xf32>
    %21 = vector.broadcast %19 : vector<1x256xf32> to vector<3x256xf32>
    %22 = arith.mulf %20, %21 : vector<3x256xf32>
    %23 = arith.addf %17, %22 : vector<3x256xf32>
    %24 = vector.extract_strided_slice %2 {offsets = [0, 3], sizes = [3, 1], strides = [1, 1]} : vector<3x4xf32> to vector<3x1xf32>
    %25 = vector.extract_strided_slice %1 {offsets = [3, 0], sizes = [1, 256], strides = [1, 1]} : vector<4x256xf32> to vector<1x256xf32>
    %26 = vector.broadcast %24 : vector<3x1xf32> to vector<3x256xf32>
    %27 = vector.broadcast %25 : vector<1x256xf32> to vector<3x256xf32>
    %28 = arith.mulf %26, %27 : vector<3x256xf32>
    %29 = arith.addf %23, %28 : vector<3x256xf32>
    %c0_6 = arith.constant 0 : index
    %c0_7 = arith.constant 0 : index
    %c0_8 = arith.constant 0 : index
    %30 = vector.load %arg5[%c0_6, %c0_7, %c0_8] : memref<1x3x256xf32, #tpu.memory_space<vmem>>, vector<1x3x256xf32>
    %31 = vector.shape_cast %30 : vector<1x3x256xf32> to vector<3x256xf32>
    %32 = vector.shape_cast %29 : vector<3x256xf32> to vector<1x3x256xf32>
    tpu.vector_store %arg5[%c0_6, %c0_7, %c0_8], %32 {strides = array<i32>} : memref<1x3x256xf32, #tpu.memory_space<vmem>>, vector<1x3x256xf32>,
    return
  }
  func.func @transform_0(%arg0: i32, %arg1: i32) -> (i32, i32, i32) {
    %c0_i32 = arith.constant 0 : i32
    %c0_i32_0 = arith.constant 0 : i32
    return %arg0, %c0_i32, %arg1 : i32, i32, i32
  }
  func.func @transform_1(%arg0: i32, %arg1: i32) -> (i32, i32) {
    %c0_i32 = arith.constant 0 : i32
    %c0_i32_0 = arith.constant 0 : i32
    %c0_i32_1 = arith.constant 0 : i32
    return %c0_i32, %c0_i32_0 : i32, i32
  }
  func.func @transform_2(%arg0: i32, %arg1: i32) -> (i32, i32) {
    %c0_i32 = arith.constant 0 : i32
    %c0_i32_0 = arith.constant 0 : i32
    %c0_i32_1 = arith.constant 0 : i32
    return %c0_i32, %c0_i32_0 : i32, i32
  }
  func.func @transform_3(%arg0: i32, %arg1: i32) -> (i32, i32, i32) {
    %c0_i32 = arith.constant 0 : i32
    %c0_i32_0 = arith.constant 0 : i32
    return %arg0, %c0_i32, %arg1 : i32, i32, i32
  }
}

</mosaic_0001>

<bundles_post_ra>
// kernel: tpu_custom_call.1
= control target key start
LH: loop header
LB: loop body
LE: loop exit
PB: predicated region body
PF: predicated region fallthrough
CT: control target
= control target key end

     0   :  { %8 = vsyncpa [#allocation3], 0  ;;  %s747_s0 = inlined_call_operand.hbm [shape: f32[2,4,256], index: 0, kind: input, shape index: {}]   ;;  %s748_s1 = inlined_call_operand.vmem [shape: f32[3,4], index: 1, kind: input, shape index: {}]   ;;  %s749_s2 = inlined_call_operand.vmem [shape: f32[3,1], index: 2, kind: input, shape index: {}]   ;;  %s750_s3 = inlined_call_operand.vmem [shape: f32[2,3,256], index: 3, kind: output, shape index: {}]  }
   0x1   :  { %10 = vsyncpa [#allocation3 + $0x1], 0  ;;  %s616_s12 = smov 0   ;;  %s618_s13 = smov 0  }
   0x2   :  { %s620_s14 = smov 0   ;;  %s622_s15 = smov 0  }
   0x3   :  { %s624_s16 = smov 0   ;;  %s626_s17 = smov 0  }
   0x4 LB: > { %s431_s18 = sadd.s32 4294967295, %s589_s17   ;;  %s28_s19 = sadd.s32 1, %s585_s16  ;;  %s589_s17 = sphi %s626_s17, %s16_s17   ;;  %s585_s16 = sphi %s624_s16, %s760_s16   ;;  %s581_s15 = sphi %s622_s15, %s759_s15   ;;  %s577_s14 = sphi %s620_s14, %s758_s14   ;;  %s573_s13 = sphi %s618_s13, %s757_s13   ;;  %s569_s12 = sphi %s616_s12, %s756_s12  }
   0x5   : > { %p30_p0 = scmp.ge.s32.totalorder %s28_s19, 2  ;;  %s37_s20 = sadd.s32 1, %s577_s14 }
   0x6   : > { %p44_p1 = scmp.ne.s32.totalorder %s577_s14, %s573_s13  ;;  %p45_p2 = scmp.eq.s32.totalorder %s589_s17, 0 }
   0x7   : > { %s762_s19 = smov (%p30_p0, %s28_s19), 0  ;;  %p50_p4 = scmp.ne.s32.totalorder %s573_s13, %s569_s12 }
   0x8   : > { %p652_p3 = por %p45_p2, %p44_p1  ;;  %s32_s22 = ssub.s32 %s585_s16, %s762_s19 }
   0x9   : > { %p51_p5 = scmp.eq.s32.totalorder %s431_s18, 0  ;;  %p35_p6 = scmp.eq.s32.totalorder %s32_s22, 0 }
   0xa   : > { %p452_p8 = scmp.lt.s32.totalorder %s589_s17, 2  ;;  %s150_s25 = sand.u32 1, %s577_s14  }
   0xb   : > { %p659_p7 = por %p51_p5, %p50_p4  ;;  %s444_s26 = sshll.u32 %s585_s16, 7 }
   0xc   : > { %s665_s24 = scalar_select %p35_p6, %s577_s14, %s37_s20  }
   0xd   : > { %s435_s27 = sshll.u32 %s150_s25, 3  ;;  %s672_s30 = scalar_lea.hbm %s747_s0, %s444_s26 }
   0xe   : > { %s154_s4 = scalar_lea.vmem [#allocation2], %s435_s27  ;;  %p676_p9 = pnand %p452_p8, %p652_p3 }
   0xf   : > { %s164_s5 = sshll.u32 %s154_s4, 4  ;;  %s151_s7 = scalar_lea.sflag [#allocation3], %s150_s25  ;;  %s680_s5 = int_to_ptr.vmem [resolvable:$true] %s164_s5 }
  0x10   : > { %s509_s8 = scalar_lea.hbm %s672_s30, 128  ;;  %p511_p13 = pneg %p676_p9 }
  0x11   : > { %p510_p12 = scmp.ne.s32.totalorder %s672_s30, %s509_s8  ;;  %s514_s11 = scalar_lea.hbm %s747_s0, 256 }
  0x12   : > { %p515_p2 = scmp.lt.u32.totalorder %s672_s30, %s747_s0  ;;  %p516_p3 = scmp.lt.u32.totalorder %s514_s11, %s509_s8 }
  0x13   : > { %p512_p0 = pnand %p511_p13, %p510_p12  ;;  %p518_p5 = scmp.lt.u32.totalorder %s509_s8, %s672_s30 }
  0x14   : > { %p517_p4 = por %p516_p3, %p515_p2 }
  0x15   : > { %p513_p1 = pneg %p512_p0 }
  0x16   : > { %p519_p6 = por %p518_p5, %p517_p4 }
  0x18   : > { %p520_p8 = pnand %p519_p6, %p513_p1 }
  0x1a   : > { %523 = shalt.err (!%p520_p8)
}
  0x1b   : > { %s524_s20 = scalar_lea.vmem %s680_s5, 128  ;;  %s591_s21 = smov [#allocation2]  }
  0x1c   : > { %p525_p12 = scmp.ne.s32.totalorder %s680_s5, %s524_s20  ;;  %s529_s22 = sshll.u32 %s591_s21, 4  ;;  %s530_s22 = int_to_ptr.vmem [resolvable:$false] %s529_s22 }
  0x1d   : > { %s531_s25 = scalar_lea.vmem %s530_s22, 256  ;;  %p532_p11 = scmp.lt.s32.totalorder %s680_s5, %s530_s22 }
  0x1e   : > { %p527_p0 = pnand %p525_p12, %p511_p13  ;;  %p533_p2 = scmp.lt.s32.totalorder %s531_s25, %s524_s20 }
  0x20   : > { %p528_p10 = pneg %p527_p0  ;;  %p534_p3 = por %p533_p2, %p532_p11 }
  0x22   : > { %p535_p4 = pnand %p534_p3, %p528_p10 }
  0x24   : > { %538 = shalt.err (!%p535_p4)
}
  0x25   : > { %451 = dma.hbm_to_vmem [thread:$0]  (!%p676_p9), %s672_s30, 128, %s680_s5, %s151_s7  }
  0x26   : > { %p754_p1 = scmp.lt.s32.totalorder %s589_s17, 3  ;;  %p755_p5 = scmp.ge.s32.totalorder %s589_s17, 1 }
  0x28   : > { %p170_p13 = pnand %p755_p5, %p754_p1 }
  0x29   : > { %s175_s26 = sand.u32 (!%p170_p13), 1, %s573_s13  }
  0x2a   : > { %173 = sbr.rel (%p170_p13) target bundleno = 196 (0xc4), region = 32  ;;  %s439_s27 = sshll.u32 (!%p170_p13), %s175_s26, 3 }
  0x2b   : > { %s176_s28 = scalar_lea.sflag (!%p170_p13), [#allocation3], %s175_s26  ;;  %s179_s29 = scalar_lea.vmem (!%p170_p13), [#allocation2], %s439_s27 }
  0x31   : > { %564 = dma.done.wait (%p659_p7), %s176_s28, 128  }
  0x32   : > { %566 = vsyncadd (%p659_p7), %s176_s28, 4294967168  ;;  %v592_v0 = vmov 0   ;;  %v593_v1 = vmov 1   ;;  %v218_v2 = vld [vmem:[%s748_s1] sm:$0x7]  ;;  %v594_v4 = vmov 2   ;;  %v231_v6 = vlaneseq }
  0x33   : > { %505 = vset.pattern.permute.xlu0 %v592_v0  ;;  %506 = vset.pattern.permute.xlu1 %v593_v1  ;;  %v219_v3 = vld [vmem:[%s749_s2] sm:$0x7]  ;;  %v595_v5 = vmov 3   ;;  %p208_p7 = scmp.lt.s32.totalorder %s581_s15, 1 }
  0x34   : > { %227 = vperm.xlu0 %505, %v218_v2   ;;  %254 = vperm.xlu1 %506, %v218_v2   ;;  %v232_v7 = vshrl.u32 %v231_v6, 7  ;;  %v217_v10 = vld [vmem:[%s179_s29] sm:$0xff] }
  0x35   : > { %s764_s15 = smov (!%p208_p7, %s581_s15), 1 }
  0x36   : > { %v233_v8 = vsub.s32 0, %v232_v7  ;;  %v237_v9 = vsub.s32 4, %v232_v7  ;;  %v259_v11 = vsub.s32 1, %v232_v7  ;;  %v263_v12 = vsub.s32 5, %v232_v7  ;;  %s445_s23 = sshll.u32 %s764_s15, 3 }
  0x37   : > { %v285_v13 = vsub.s32 2, %v232_v7  ;;  %v289_v14 = vsub.s32 6, %v232_v7  ;;  %v311_v21 = vsub.s32 3, %v232_v7  ;;  %v315_v22 = vsub.s32 7, %v232_v7  ;;  %s215_s9 = scalar_lea.vmem %s750_s3, %s445_s23 }
  0x38   : > { %222 = vperm.xlu0 %505, %v219_v3   ;;  %507 = vset.pattern.permute.xlu1 %v594_v4  ;;  %v234_v15 = vrot.slane %v217_v10, %v233_v8  ;;  %v238_v16 = vrot.slane %v217_v10, %v237_v9  ;;  %v260_v17 = vrot.slane %v217_v10, %v259_v11 }
  0x39   : > { %280 = vperm.xlu1 %507, %v218_v2   ;;  %v264_v18 = vrot.slane %v217_v10, %v263_v12  ;;  %v286_v19 = vrot.slane %v217_v10, %v285_v13  ;;  %v290_v20 = vrot.slane %v217_v10, %v289_v14  ;;  %v312_v31 = vrot.slane %v217_v10, %v311_v21 }
  0x3a   : > { %v244_v23 = vrot.slane %v234_v15, %v233_v8  ;;  %v248_v24 = vrot.slane %v238_v16, %v233_v8  ;;  %v270_v27 = vrot.slane %v260_v17, %v259_v11  ;;  %v316_v32 = vrot.slane %v217_v10, %v315_v22 }
  0x3b   : > { %v274_v28 = vrot.slane %v264_v18, %v259_v11  ;;  %v296_v29 = vrot.slane %v286_v19, %v285_v13  ;;  %v300_v30 = vrot.slane %v290_v20, %v285_v13  ;;  %v322_v43 = vrot.slane %v312_v31, %v311_v21 }
  0x3c   : > { %508 = vset.pattern.permute.xlu0 %v595_v5  ;;  %v326_v44 = vrot.slane %v316_v32, %v311_v21 }
  0x3d   : > { %306 = vperm.xlu0 %508, %v218_v2  }
  0xb3   : > { %v228_v25 = vpop.permute.xlu0 %227  ;;  %v255_v26 = vpop.permute.xlu1 %254 }
  0xb4   : > { %v249_v33 = vmul.f32 %v244_v23, %v228_v25  ;;  %v250_v34 = vmul.f32 %v248_v24, %v228_v25  ;;  %v275_v36 = vmul.f32 %v270_v27, %v255_v26  ;;  %v276_v37 = vmul.f32 %v274_v28, %v255_v26 }
  0xb7   : > { %v223_v35 = vpop.permute.xlu0 %222 }
  0xb8   : > { %v251_v38 = vadd.f32 %v249_v33, %v223_v35  ;;  %v252_v39 = vadd.f32 %v250_v34, %v223_v35  ;;  %v281_v40 = vpop.permute.xlu1 %280 }
  0xb9   : > { %v301_v41 = vmul.f32 %v296_v29, %v281_v40  ;;  %v302_v42 = vmul.f32 %v300_v30, %v281_v40 }
  0xba   : > { %v277_v45 = vadd.f32 %v275_v36, %v251_v38  ;;  %v278_v46 = vadd.f32 %v276_v37, %v252_v39 }
  0xbc   : > { %v303_v47 = vadd.f32 %v301_v41, %v277_v45  ;;  %v304_v48 = vadd.f32 %v302_v42, %v278_v46  ;;  %v307_v49 = vpop.permute.xlu0 %306 }
  0xbd   : > { %v327_v50 = vmul.f32 %v322_v43, %v307_v49  ;;  %v328_v51 = vmul.f32 %v326_v44, %v307_v49 }
  0xbf   : > { %v329_v52 = vadd.f32 %v327_v50, %v303_v47  ;;  %v330_v53 = vadd.f32 %v328_v51, %v304_v48 }
  0xc1   : > { %v333_v54 = vcombine.low %v329_v52, %v330_v53 }
  0xc3   : > { %335 = vst [vmem:[%s215_s9] sm:$0x77] %v333_v54 }
  0xc4 PF: > { %s16_s17 = sadd.s32 1, %s589_s17   ;;  %s756_s12 = smov %s573_s13 }
  0xc5   : > { %p13_p9 = scmp.ge.s32.totalorder %s16_s17, 4   ;;  %s757_s13 = smov %s577_s14 }
  0xc6   : > { %s758_s14 = smov %s665_s24  ;;  %s759_s15 = smov %s585_s16 }
  0xc7   : > { %s760_s16 = smov %s762_s19  ;;  %15 = sbr.rel (!%p13_p9) target bundleno = 4 (0x4), region = 72 }
  0xce   :  { %366 = vsyncpa [#allocation3], 1 }
  0xcf   :  { %368 = vsyncpa [#allocation3 + $0x1], 1 }

</bundles_post_ra>
